<compile_context>
chip_gen: v7x
topology: tpu7x:2x2x1
jax: 0.10.0
libtpu: 0.0.40
codegen_flags: <defaults>
</compile_context>

<pallas_src>
import functools

import jax
import jax.numpy as jnp
from jax.experimental import pallas as pl
from jax.experimental.pallas import tpu as pltpu

LANES = 128
SUBLANES = 8
# Combined bytes streamed per grid step across both inputs (= 4 MiB/input for
# f32 -> block_rows = 8192).  Double-buffered footprint = 2x this.
TARGET_STEP_BYTES = 8 * 1024 * 1024
# Explicit scoped-VMEM limit: covers the 16 MiB double-buffered footprint plus
# compiler temporaries; < 64 MiB physical on v7x, well under 128 MiB elsewhere.
VMEM_LIMIT_BYTES = 48 * 1024 * 1024


def _dice_kernel(x_ref, t_ref, out_ref, *, block_rows):
    x = x_ref[...].astype(jnp.float32)
    t = t_ref[...].astype(jnp.float32)
    # sigmoid(x) = 0.5 * (tanh(x/2) + 1): single EUP transcendental per element
    # and no per-element divide on the VALU.
    s = 0.5 * (jnp.tanh(0.5 * x) + 1.0)
    groups = block_rows // SUBLANES
    # Per-block vector partials: cheap VPU adds, one (8,128) result per term.
    inter = (s * t).reshape(groups, SUBLANES, LANES).sum(axis=0)
    denom = (s + t).reshape(groups, SUBLANES, LANES).sum(axis=0)
    # Packed lane-dense output block: one store/DMA per step.
    out_ref[0, 0] = inter
    out_ref[0, 1] = denom


def _sublane_packing(dtype):
    # 32-bit dtypes -> 1, 16-bit -> 2, 8-bit/bool -> 4 (sublane packing factor).
    return max(1, 4 // jnp.dtype(dtype).itemsize)


def dice_loss(inputs, targets, smooth=1.0):
    """Pallas TPU implementation of DiceLoss.forward."""
    x = inputs.reshape(-1)
    t = targets.reshape(-1)
    n = x.shape[0]

    # Row alignment honouring packed-sublane tiling of the narrower dtype
    # (8 rows for 32-bit, 16 for bf16, 32 for int8/bool).
    align = SUBLANES * max(_sublane_packing(x.dtype), _sublane_packing(t.dtype))

    rows = n // LANES                  # complete 128-lane rows available
    lane_rem = n - rows * LANES        # leftover (< 128) elements

    bytes_per_row = LANES * (jnp.dtype(x.dtype).itemsize +
                             jnp.dtype(t.dtype).itemsize)
    target_rows = max(align,
                      (TARGET_STEP_BYTES // bytes_per_row) // align * align)

    block_rows = min(target_rows, (rows // align) * align)
    num_blocks = 0
    if block_rows >= align:
        num_blocks = rows // block_rows
        # Prefer >= 2 grid steps so the "parallel" axis can shard across both
        # TensorCores on v7x (no effect on single-TC v5e/v6e).
        if num_blocks == 1 and block_rows >= 2 * align:
            block_rows = (block_rows // 2 // align) * align
            num_blocks = rows // block_rows

    main_rows = num_blocks * block_rows
    main_elems = main_rows * LANES

    # Tail (< one block, plus any non-128-aligned remainder): tiny, summed in
    # JAX.  Replaces the old jnp.pad copy and the per-step in-kernel mask.
    tail_inter = jnp.float32(0.0)
    tail_denom = jnp.float32(0.0)
    if main_elems < n:
        s_tail = jax.nn.sigmoid(x[main_elems:].astype(jnp.float32))
        t_tail = t[main_elems:].astype(jnp.float32)
        tail_inter = jnp.sum(s_tail * t_tail)
        tail_denom = jnp.sum(s_tail) + jnp.sum(t_tail)

    if num_blocks > 0:
        if lane_rem == 0:
            x2 = x.reshape(rows, LANES)   # free reshape: zero extra HBM traffic
            t2 = t.reshape(rows, LANES)
        else:
            # TODO(synk): when n % 128 != 0 this prefix slice still copies the
            # inputs once; a fully copy-free ragged path needs 1-D blocks.
            x2 = x[:rows * LANES].reshape(rows, LANES)
            t2 = t[:rows * LANES].reshape(rows, LANES)

        kernel = functools.partial(_dice_kernel, block_rows=block_rows)
        partials = pl.pallas_call(
            kernel,
            out_shape=jax.ShapeDtypeStruct(
                (num_blocks, 2, SUBLANES, LANES), jnp.float32),
            grid=(num_blocks,),
            in_specs=[
                pl.BlockSpec((block_rows, LANES), lambda i: (i, 0)),
                pl.BlockSpec((block_rows, LANES), lambda i: (i, 0)),
            ],
            out_specs=pl.BlockSpec((1, 2, SUBLANES, LANES),
                                   lambda i: (i, 0, 0, 0)),
            compiler_params=pltpu.CompilerParams(
                # No cross-step state -> shard grid across TensorCores.
                dimension_semantics=("parallel",),
                vmem_limit_bytes=VMEM_LIMIT_BYTES,
            ),
        )(x2, t2)
        sums = jnp.sum(partials, axis=(0, 2, 3))   # (2,): [inter, sig+t]
        intersection = sums[0] + tail_inter
        denominator = sums[1] + tail_denom
    else:
        intersection = tail_inter
        denominator = tail_denom

    dice = (2.0 * intersection + smooth) / (denominator + smooth)
    return 1.0 - dice


def dice_loss_ref(inputs, targets, smooth=1.0):
    x = jax.nn.sigmoid(inputs.astype(jnp.float32)).reshape(-1)
    t = targets.astype(jnp.float32).reshape(-1)
    inter = jnp.sum(x * t)
    dice = (2.0 * inter + smooth) / (jnp.sum(x) + jnp.sum(t) + smooth)
    return 1.0 - dice


if __name__ == "__main__":
    key = jax.random.PRNGKey(0)
    k1, k2, k3, k4 = jax.random.split(key, 4)

    # NCHW, matching typical segmentation logits/targets (128-divisible case,
    # fully copy-free path; kernel runs with 2 grid steps).
    x = jax.random.normal(k1, (2, 4, 16, 16), dtype=jnp.float32)
    tgt = (jax.random.uniform(k2, (2, 4, 16, 16)) > 0.5).astype(jnp.float32)
    loss = jax.block_until_ready(dice_loss(x, tgt))
    ref = jax.block_until_ready(dice_loss_ref(x, tgt))
    assert jnp.allclose(loss, ref, atol=1e-5, rtol=1e-5), (loss, ref)

    # Ragged case exercising the JAX-side tail path (n not a tile multiple).
    x_odd = jax.random.normal(k3, (2, 3, 15, 17), dtype=jnp.float32)
    t_odd = (jax.random.uniform(k4, (2, 3, 15, 17)) > 0.5).astype(jnp.float32)
    loss_odd = jax.block_until_ready(dice_loss(x_odd, t_odd))
    ref_odd = jax.block_until_ready(dice_loss_ref(x_odd, t_odd))
    assert jnp.allclose(loss_odd, ref_odd, atol=1e-5, rtol=1e-5), (loss_odd,
                                                                   ref_odd)

    print("KERNEL_OK")
</pallas_src>

<mosaic_0001>
module attributes {stable_mosaic.version = 11 : i64} {
  func.func @_dice_kernel(%arg0: i32, %arg1: memref<8x128xf32, #tpu.memory_space<vmem>>, %arg2: memref<8x128xf32, #tpu.memory_space<vmem>>, %arg3: memref<1x2x8x128xf32, #tpu.memory_space<vmem>>) attributes {dimension_semantics = [#tpu.dimension_semantics<parallel>], iteration_bounds = array<i64: 2>, scalar_prefetch = 0 : i64, scratch_operands = 0 : i64, tpu.core_type = #tpu.core_type<tc>, window_params = [{transform_indices = @transform_0, window_bounds = array<i64: 8, 128>}, {transform_indices = @transform_1, window_bounds = array<i64: 8, 128>}, {transform_indices = @transform_2, window_bounds = array<i64: 1, 2, 8, 128>}]} {
    %c0 = arith.constant 0 : index
    %c0_0 = arith.constant 0 : index
    %0 = vector.load %arg1[%c0, %c0_0] : memref<8x128xf32, #tpu.memory_space<vmem>>, vector<8x128xf32>
    %c0_1 = arith.constant 0 : index
    %c0_2 = arith.constant 0 : index
    %1 = vector.load %arg2[%c0_1, %c0_2] : memref<8x128xf32, #tpu.memory_space<vmem>>, vector<8x128xf32>
    %cst = arith.constant 5.000000e-01 : f32
    %2 = vector.broadcast %cst : f32 to vector<8x128xf32>
    %3 = arith.mulf %2, %0 : vector<8x128xf32>
    %4 = math.tanh %3 : vector<8x128xf32>
    %cst_3 = arith.constant 1.000000e+00 : f32
    %5 = vector.broadcast %cst_3 : f32 to vector<8x128xf32>
    %6 = arith.addf %4, %5 : vector<8x128xf32>
    %cst_4 = arith.constant 5.000000e-01 : f32
    %7 = vector.broadcast %cst_4 : f32 to vector<8x128xf32>
    %8 = arith.mulf %7, %6 : vector<8x128xf32>
    %9 = arith.mulf %8, %1 : vector<8x128xf32>
    %10 = vector.shape_cast %9 : vector<8x128xf32> to vector<1x8x128xf32>
    %cst_5 = arith.constant dense<0.000000e+00> : vector<8x128xf32>
    %11 = vector.multi_reduction <add>, %10, %cst_5 [0] : vector<1x8x128xf32> to vector<8x128xf32>
    %12 = arith.addf %8, %1 : vector<8x128xf32>
    %13 = vector.shape_cast %12 : vector<8x128xf32> to vector<1x8x128xf32>
    %cst_6 = arith.constant dense<0.000000e+00> : vector<8x128xf32>
    %14 = vector.multi_reduction <add>, %13, %cst_6 [0] : vector<1x8x128xf32> to vector<8x128xf32>
    %c0_7 = arith.constant 0 : index
    %c0_8 = arith.constant 0 : index
    %c0_9 = arith.constant 0 : index
    %c0_10 = arith.constant 0 : index
    %15 = vector.load %arg3[%c0_7, %c0_8, %c0_9, %c0_10] : memref<1x2x8x128xf32, #tpu.memory_space<vmem>>, vector<1x1x8x128xf32>
    %16 = vector.shape_cast %15 : vector<1x1x8x128xf32> to vector<8x128xf32>
    %17 = vector.shape_cast %11 : vector<8x128xf32> to vector<1x1x8x128xf32>
    tpu.vector_store %arg3[%c0_7, %c0_8, %c0_9, %c0_10], %17 {strides = array<i32>} : memref<1x2x8x128xf32, #tpu.memory_space<vmem>>, vector<1x1x8x128xf32>,
    %c0_11 = arith.constant 0 : index
    %c1 = arith.constant 1 : index
    %c0_12 = arith.constant 0 : index
    %c0_13 = arith.constant 0 : index
    %18 = vector.load %arg3[%c0_11, %c1, %c0_12, %c0_13] : memref<1x2x8x128xf32, #tpu.memory_space<vmem>>, vector<1x1x8x128xf32>
    %19 = vector.shape_cast %18 : vector<1x1x8x128xf32> to vector<8x128xf32>
    %20 = vector.shape_cast %14 : vector<8x128xf32> to vector<1x1x8x128xf32>
    tpu.vector_store %arg3[%c0_11, %c1, %c0_12, %c0_13], %20 {strides = array<i32>} : memref<1x2x8x128xf32, #tpu.memory_space<vmem>>, vector<1x1x8x128xf32>,
    return
  }
  func.func @transform_0(%arg0: i32) -> (i32, i32) {
    %c0_i32 = arith.constant 0 : i32
    %c0_i32_0 = arith.constant 0 : i32
    return %arg0, %c0_i32 : i32, i32
  }
  func.func @transform_1(%arg0: i32) -> (i32, i32) {
    %c0_i32 = arith.constant 0 : i32
    %c0_i32_0 = arith.constant 0 : i32
    return %arg0, %c0_i32 : i32, i32
  }
  func.func @transform_2(%arg0: i32) -> (i32, i32, i32, i32) {
    %c0_i32 = arith.constant 0 : i32
    %c0_i32_0 = arith.constant 0 : i32
    %c0_i32_1 = arith.constant 0 : i32
    %c0_i32_2 = arith.constant 0 : i32
    return %arg0, %c0_i32, %c0_i32_0, %c0_i32_1 : i32, i32, i32, i32
  }
}

</mosaic_0001>

<bundles_post_ra>
// kernel: tpu_custom_call.1
= control target key start
LH: loop header
LB: loop body
LE: loop exit
PB: predicated region body
PF: predicated region fallthrough
CT: control target
= control target key end

     0   :  { %7 = vsyncpa [#allocation3], 0  ;;  %s756_s0 = inlined_call_operand.hbm [shape: f32[16,128], index: 0, kind: input, shape index: {}]   ;;  %s757_s1 = inlined_call_operand.hbm [shape: f32[16,128], index: 1, kind: input, shape index: {}]   ;;  %s758_s2 = inlined_call_operand.hbm [shape: f32[2,2,8,128], index: 2, kind: output, shape index: {}]  }
   0x1   :  { %9 = vsyncpa [#allocation3 + $0x1], 0 }
   0x2   :  { %10 = vsyncpa [#allocation6], 0 }
   0x3   :  { %12 = vsyncpa [#allocation6 + $0x1], 0 }
   0x4   :  { %13 = vsyncpa [#allocation4], 0 }
   0x5   :  { %15 = vsyncpa [#allocation4 + $0x1], 0  ;;  %s544_s9 = smov 0   ;;  %s546_s10 = smov 0  }
   0x6   :  { %s548_s11 = smov 0   ;;  %s550_s12 = smov 0  }
   0x7 LB: > { %s565_s13 = sadd.s32 4294967295, %s522_s12   ;;  %s319_s14 = sadd.s32 4294967294, %s522_s12   ;;  %s522_s12 = sphi %s550_s12, %s777_s12   ;;  %s518_s11 = sphi %s548_s11, %s776_s11   ;;  %s514_s10 = sphi %s546_s10, %s775_s10   ;;  %s510_s9 = sphi %s544_s9, %s774_s9  }
   0x8   : > { %s569_s15 = sadd.s32 1, %s522_s12   ;;  %s28_s16 = sadd.s32 1, %s518_s11 }
   0x9   : > { %s25_s17 = ssub.s32 %s522_s12, %s569_s15  ;;  %p35_p0 = scmp.ne.s32.totalorder %s518_s11, %s514_s10 }
   0xa   : > { %p26_p1 = scmp.eq.s32.totalorder %s25_s17, 0  ;;  %p36_p2 = scmp.eq.s32.totalorder %s522_s12, 0 }
   0xb   : > { %p41_p3 = scmp.ne.s32.totalorder %s514_s10, %s510_s9  ;;  %p42_p4 = scmp.eq.s32.totalorder %s565_s13, 0 }
   0xc   : > { %s581_s18 = scalar_select %p26_p1, %s518_s11, %s28_s16  }
   0xd   : > { %p583_p5 = por %p36_p2, %p35_p0  ;;  %p587_p6 = por %p42_p4, %p41_p3 }
   0xe   : > { %p91_p7 = scmp.eq.s32.totalorder %s565_s13, 1  ;;  %p97_p8 = scmp.eq.s32.totalorder %s319_s14, 1 }
   0xf   : > { %s762_s20 = scalar_select %p587_p6, 1, 0 }
  0x10   : > { %p354_p10 = scmp.lt.s32.totalorder %s522_s12, 2  ;;  %p594_p11 = por %p91_p7, %p35_p0 }
  0x11   : > { %p598_p12 = por %p97_p8, %p41_p3  ;;  %s603_s23 = sand.u32 1, %s518_s11  }
  0x12   : > { %s763_s21 = scalar_select %p594_p11, 1, 0 }
  0x13   : > { %s764_s22 = scalar_select %p598_p12, 1, 0 }
  0x14   : > { %s323_s24 = sshll.u32 %s522_s12, 7  ;;  %s322_s25 = sshll.u32 %s603_s23, 3 }
  0x15   : > { %s612_s28 = scalar_lea.hbm %s756_s0, %s323_s24  ;;  %s121_s29 = scalar_lea.vmem [#allocation2], %s322_s25 }
  0x16   : > { %s128_s30 = sshll.u32 %s121_s29, 4  ;;  %p618_p13 = pnand %p354_p10, %p583_p5  ;;  %s622_s30 = int_to_ptr.vmem [resolvable:$true] %s128_s30 }
  0x17   : > { %s118_s4 = scalar_lea.sflag [#allocation3], %s603_s23  ;;  %s392_s5 = scalar_lea.hbm %s612_s28, 128 }
  0x18   : > { %p393_p2 = scmp.ne.s32.totalorder %s612_s28, %s392_s5  ;;  %p394_p3 = pneg %p618_p13 }
  0x19   : > { %s397_s8 = scalar_lea.hbm %s756_s0, 256  ;;  %p398_p5 = scmp.lt.u32.totalorder %s612_s28, %s756_s0 }
  0x1a   : > { %p395_p4 = pnand %p394_p3, %p393_p2  ;;  %p399_p8 = scmp.lt.u32.totalorder %s397_s8, %s392_s5 }
  0x1b   : > { %p401_p9 = scmp.lt.u32.totalorder %s392_s5, %s612_s28 }
  0x1c   : > { %p396_p7 = pneg %p395_p4  ;;  %p400_p10 = por %p399_p8, %p398_p5 }
  0x1e   : > { %p402_p0 = por %p401_p9, %p400_p10 }
  0x20   : > { %p403_p1 = pnand %p402_p0, %p396_p7 }
  0x22   : > { %406 = shalt.err (!%p403_p1)
}
  0x23   : > { %s407_s17 = scalar_lea.vmem %s622_s30, 128  ;;  %s524_s19 = smov [#allocation2]  }
  0x24   : > { %p408_p2 = scmp.ne.s32.totalorder %s622_s30, %s407_s17  ;;  %s412_s26 = sshll.u32 %s524_s19, 4  ;;  %s413_s26 = int_to_ptr.vmem [resolvable:$false] %s412_s26 }
  0x25   : > { %s414_s27 = scalar_lea.vmem %s413_s26, 256  ;;  %p415_p11 = scmp.lt.s32.totalorder %s622_s30, %s413_s26 }
  0x26   : > { %p410_p4 = pnand %p408_p2, %p394_p3  ;;  %p416_p5 = scmp.lt.s32.totalorder %s414_s27, %s407_s17 }
  0x28   : > { %p411_p12 = pneg %p410_p4  ;;  %p417_p8 = por %p416_p5, %p415_p11 }
  0x2a   : > { %p418_p9 = pnand %p417_p8, %p411_p12 }
  0x2c   : > { %421 = shalt.err (!%p418_p9)
}
  0x2d   : > { %346 = dma.hbm_to_vmem [thread:$0]  (!%p618_p13), %s612_s28, 128, %s622_s30, %s118_s4  }
  0x2e   : > { %p766_p0 = scmp.lt.s32.totalorder %s522_s12, 3  ;;  %p767_p1 = scmp.ge.s32.totalorder %s522_s12, 1 }
  0x2f   : > { %s665_s7 = scalar_lea.hbm %s757_s1, %s323_s24  ;;  %s139_s8 = scalar_lea.vmem [#allocation5], %s322_s25 }
  0x30   : > { %p656_p7 = pnand %p767_p1, %p766_p0  ;;  %s146_s14 = sshll.u32 %s139_s8, 4  ;;  %s147_s14 = int_to_ptr.vmem [resolvable:$true] %s146_s14 }
  0x31   : > { %s136_s28 = scalar_lea.sflag [#allocation6], %s603_s23  ;;  %s422_s30 = scalar_lea.hbm %s665_s7, 128 }
  0x32   : > { %s768_s29 = scalar_select %p656_p7, 1, 0 }
  0x33   : > { %p423_p11 = scmp.ne.s32.totalorder %s665_s7, %s422_s30  ;;  %s427_s24 = scalar_lea.hbm %s757_s1, 256 }
  0x34   : > { %p428_p2 = scmp.lt.u32.totalorder %s665_s7, %s757_s1  ;;  %p429_p4 = scmp.lt.u32.totalorder %s427_s24, %s422_s30 }
  0x35   : > { %p425_p12 = pnand %p423_p11, %p394_p3  ;;  %p431_p8 = scmp.lt.u32.totalorder %s422_s30, %s665_s7 }
  0x36   : > { %p430_p5 = por %p429_p4, %p428_p2 }
  0x37   : > { %p426_p10 = pneg %p425_p12 }
  0x38   : > { %p432_p9 = por %p431_p8, %p430_p5 }
  0x3a   : > { %p433_p0 = pnand %p432_p9, %p426_p10 }
  0x3c   : > { %436 = shalt.err (!%p433_p0)
}
  0x3d   : > { %s437_s23 = scalar_lea.vmem %s147_s14, 128  ;;  %s525_s25 = smov [#allocation5]  }
  0x3e   : > { %p438_p1 = scmp.ne.s32.totalorder %s147_s14, %s437_s23  ;;  %s442_s26 = sshll.u32 %s525_s25, 4  ;;  %s443_s26 = int_to_ptr.vmem [resolvable:$false] %s442_s26 }
  0x3f   : > { %s444_s27 = scalar_lea.vmem %s443_s26, 256  ;;  %p445_p6 = scmp.lt.s32.totalorder %s147_s14, %s443_s26 }
  0x40   : > { %p440_p11 = pnand %p438_p1, %p394_p3  ;;  %p446_p7 = scmp.lt.s32.totalorder %s444_s27, %s437_s23 }
  0x42   : > { %p441_p12 = pneg %p440_p11  ;;  %p447_p2 = por %p446_p7, %p445_p6 }
  0x44   : > { %p448_p4 = pnand %p447_p2, %p441_p12 }
  0x46   : > { %451 = shalt.err (!%p448_p4)
}
  0x47   : > { %349 = dma.hbm_to_vmem [thread:$0]  (!%p618_p13), %s665_s7, 128, %s147_s14, %s136_s28  }
  0x48   : > { %p769_p10 = scmp.ne.s32.totalorder %s768_s29, 0 }
  0x49   : > { %s692_s5 = sand.u32 (!%p769_p10), 1, %s514_s10   ;;  %p770_p3 = scmp.ne.s32.totalorder (!%p769_p10), %s762_s20, 0 }
  0x4a   : > { %155 = sbr.rel (%p769_p10) target bundleno = 119 (0x77), region = 28  ;;  %s327_s6 = sshll.u32 (!%p769_p10), %s692_s5, 3 }
  0x4b   : > { %s158_s8 = scalar_lea.sflag (!%p769_p10), [#allocation3], %s692_s5  ;;  %s161_s30 = scalar_lea.vmem (!%p769_p10), [#allocation2], %s327_s6 }
  0x51   : > { %497 = dma.done.wait (%p770_p3), %s158_s8, 128  }
  0x52   : > { %499 = vsyncadd (%p770_p3), %s158_s8, 4294967168  ;;  %s167_s3 = scalar_lea.sflag [#allocation6], %s692_s5  ;;  %s170_s7 = scalar_lea.vmem [#allocation5], %s327_s6 }
  0x53   : > { %501 = dma.done.wait (%p770_p3), %s167_s3, 128  }
  0x54   : > { %503 = vsyncadd (%p770_p3), %s167_s3, 4294967168  ;;  %v196_v0 = vld [vmem:[%s161_s30] sm:$0xff]  ;;  %s329_s29 = sshll.u32 %s692_s5, 4  ;;  %s336_s4 = sshll.u32 %s565_s13, 8  ;;  %v197_v4 = vld [vmem:[%s170_s7] sm:$0xff] }
  0x55   : > { %v198_v1 = vmul.f32 0.5, %v196_v0  ;;  %s195_s14 = scalar_lea.vmem [#allocation7], %s329_s29  ;;  %s712_s24 = scalar_lea.hbm %s758_s2, %s336_s4 }
  0x56   : > { %s223_s28 = sshll.u32 %s195_s14, 4  ;;  %s210_s17 = scalar_lea.sflag [#allocation4], %s692_s5  ;;  %s707_s28 = int_to_ptr.vmem [resolvable:$true] %s223_s28 }
  0x57   : > { %390 = vtanh.f32 %v198_v1  ;;  %s452_s19 = scalar_lea.vmem %s707_s28, 256  ;;  %p771_p13 = scmp.ne.s32.totalorder %s763_s21, 0 }
  0x58   : > { %p453_p6 = scmp.ne.s32.totalorder %s707_s28, %s452_s19  ;;  %s526_s13 = smov [#allocation7]  }
  0x59   : > { %s456_s23 = sshll.u32 %s526_s13, 4  ;;  %s457_s23 = int_to_ptr.vmem [resolvable:$false] %s456_s23 }
  0x5a   : > { %p454_p7 = pnand %p453_p6, %p771_p13  ;;  %s458_s25 = scalar_lea.vmem %s457_s23, 512 }
  0x5b   : > { %p459_p8 = scmp.lt.s32.totalorder %s707_s28, %s457_s23  ;;  %p460_p9 = scmp.lt.s32.totalorder %s458_s25, %s452_s19 }
  0x5c   : > { %p455_p5 = pneg %p454_p7 }
  0x5d   : > { %p461_p0 = por %p460_p9, %p459_p8 }
  0x5f   : > { %p462_p1 = pnand %p461_p0, %p455_p5 }
  0x61   : > { %v391_v2 = vpop.eup %390 }
  0x62   : > { %v200_v3 = vadd.f32 1.0, %v391_v2 }
  0x64   : > { %v201_v5 = vmul.f32 0.5, %v200_v3 }
  0x66   : > { %v202_v6 = vmul.f32 %v201_v5, %v197_v4  ;;  %v204_v7 = vadd.f32 %v201_v5, %v197_v4 }
  0x68   : > { %206 = vst [vmem:[%s195_s14] sm:$0xff] %v202_v6  ;;  %330 = vst [vmem:[%s195_s14 + $0x8] sm:$0xff] %v204_v7 }
  0x69   : > { %465 = shalt.err (!%p462_p1)
}
  0x6a   : > { %s466_s26 = scalar_lea.hbm %s712_s24, 256  ;;  %s470_s8 = scalar_lea.hbm %s758_s2, 512 }
  0x6b   : > { %p467_p11 = scmp.ne.s32.totalorder %s712_s24, %s466_s26  ;;  %p471_p4 = scmp.lt.u32.totalorder %s712_s24, %s758_s2 }
  0x6c   : > { %p472_p10 = scmp.lt.u32.totalorder %s470_s8, %s466_s26  ;;  %p474_p6 = scmp.lt.u32.totalorder %s466_s26, %s712_s24 }
  0x6d   : > { %p468_p12 = pnand %p467_p11, %p771_p13 }
  0x6e   : > { %p473_p3 = por %p472_p10, %p471_p4 }
  0x6f   : > { %p469_p2 = pneg %p468_p12 }
  0x70   : > { %p475_p7 = por %p474_p6, %p473_p3 }
  0x72   : > { %p476_p5 = pnand %p475_p7, %p469_p2 }
  0x74   : > { %479 = shalt.err (!%p476_p5)
}
  0x75   : > { %s527_s7 = smov 128   ;;  %s528_s29 = smov 8  }
  0x76   : > { %341 = dma.vmem_to_hbm [thread:$0]  (%p771_p13), %s707_s28, 256, %s712_s24, %s210_s17, %s527_s7, %s527_s7, %s528_s29  }
  0x77 PF: > { %s238_s14 = sand.u32 1, %s510_s9   ;;  %p772_p8 = scmp.ne.s32.totalorder %s764_s22, 0 }
  0x78   : > { %p773_p9 = scmp.ge.s32.totalorder %s522_s12, 2  ;;  %s239_s4 = scalar_lea.sflag [#allocation4], %s238_s14 }
  0x7a   : > { %p351_p0 = pnand %p773_p9, %p772_p8 }
  0x7c   : > { %505 = dma.done.wait (!%p351_p0), %s239_s4, 256  }
  0x7d   : > { %507 = vsyncadd (!%p351_p0), %s239_s4, 4294967040  ;;  %p18_p1 = scmp.ge.s32.totalorder %s569_s15, 4   ;;  %s774_s9 = smov %s514_s10 }
  0x7e   : > { %s775_s10 = smov %s518_s11  ;;  %s776_s11 = smov %s581_s18 }
  0x7f   : > { %s777_s12 = smov %s569_s15  ;;  %20 = sbr.rel (!%p18_p1) target bundleno = 7 (0x7), region = 87 }
  0x86   :  { %244 = vsyncpa [#allocation3], 1 }
  0x87   :  { %246 = vsyncpa [#allocation3 + $0x1], 1 }
  0x88   :  { %247 = vsyncpa [#allocation6], 1 }
  0x89   :  { %249 = vsyncpa [#allocation6 + $0x1], 1 }
  0x8a   :  { %250 = vsyncpa [#allocation4], 1 }
  0x8b   :  { %252 = vsyncpa [#allocation4 + $0x1], 1 }

</bundles_post_ra>
